<compile_context>
chip_gen: v5e
topology: v5e:2x2
jax: 0.10.0
libtpu: 0.0.40
codegen_flags: <defaults>
</compile_context>

<pallas_src>
import functools

import jax
import jax.numpy as jnp
from jax.experimental import pallas as pl
from jax.experimental.pallas import tpu as pltpu


def _round_up(x, m):
    return (x + m - 1) // m * m


def cirplus_bank_ce_kernel(refer_ref, text_ref, lbl_ref, tgt_ref, loss_ref,
                           q_sc, m_sc, l_sc, lbl_sc, *, tau, m_valid):
    """Streaming InfoNCE cross-entropy over target-bank blocks (online logsumexp)."""
    m = pl.program_id(1)                       # M-block index (reduction axis, last)
    bn = refer_ref.shape[0]
    bm = tgt_ref.shape[0]

    @pl.when(m == 0)
    def _init():
        # element_wise_sum + F.normalize(p=2, dim=1, eps=1e-12), all in f32.
        q = refer_ref[...].astype(jnp.float32) + text_ref[...].astype(jnp.float32)
        norm = jnp.sqrt(jnp.sum(q * q, axis=-1, keepdims=True))
        q = q / jnp.maximum(norm, 1e-12)
        # Fold temperature into the LHS, then cast once to bf16 for the MXU.
        q_sc[...] = (q * (1.0 / tau)).astype(q_sc.dtype)
        m_sc[...] = jnp.full_like(m_sc, -1e30)
        l_sc[...] = jnp.zeros_like(l_sc)
        lbl_sc[...] = jnp.zeros_like(lbl_sc)

    # logits block: (bn, bm) = q_scaled @ tgt_block^T, contracting on the last dims
    # (no in-kernel transpose of the bank), bf16 operands, f32 accumulation.
    logits = jax.lax.dot_general(
        q_sc[...], tgt_ref[...],
        dimension_numbers=(((1,), (1,)), ((), ())),
        preferred_element_type=jnp.float32)

    # Mask padded bank rows (M was padded to a multiple of bm in the wrapper).
    col = m * bm + jax.lax.broadcasted_iota(jnp.int32, (bn, bm), 1)
    logits = jnp.where(col < m_valid, logits, -1e30)

    # Online logsumexp accumulation.
    m_prev = m_sc[...]
    m_new = jnp.maximum(m_prev, jnp.max(logits, axis=-1, keepdims=True))
    alpha = jnp.exp(m_prev - m_new)
    l_sc[...] = alpha * l_sc[...] + jnp.sum(jnp.exp(logits - m_new),
                                            axis=-1, keepdims=True)
    m_sc[...] = m_new

    # Label logit: compare only against this block's global column indices.
    hit = col == lbl_ref[...]
    lbl_sc[...] += jnp.sum(jnp.where(hit, logits, 0.0), axis=-1, keepdims=True)

    @pl.when(m == pl.num_programs(1) - 1)
    def _finalize():
        per_row = m_sc[...] + jnp.log(l_sc[...]) - lbl_sc[...]          # (bn, 1)
        loss_ref[...] = jnp.broadcast_to(per_row, loss_ref.shape)       # lane-dense


def cirplus_bank_loss(text_feats, refer_bank, target_bank, indexs, target_indexs,
                      *, tau=0.01, block_n=128, block_m=256):
    """Pallas implementation of CIRPlus.bank_large_step + infonce_loss (mean CE)."""
    n, d = text_feats.shape
    m_valid = target_bank.shape[0]

    # refer_bank[indexs] gather in the wrapper (replaces the old in-kernel one-hot
    # matmul).  Note: out-of-range indices clamp here, whereas PyTorch would raise.
    refer_sel = jnp.take(refer_bank, indexs.astype(jnp.int32), axis=0)

    # bf16 MXU operands; in-kernel norm / softmax statistics stay f32.
    refer_b = refer_sel.astype(jnp.bfloat16)
    text_b = text_feats.astype(jnp.bfloat16)
    target_b = target_bank.astype(jnp.bfloat16)

    # Block / pad sizes.
    bn = min(block_n, _round_up(n, 16))
    bm = min(block_m, _round_up(m_valid, 128))
    n_pad = _round_up(n, bn)
    m_pad = _round_up(m_valid, bm)

    refer_b = jnp.pad(refer_b, ((0, n_pad - n), (0, 0)))
    text_b = jnp.pad(text_b, ((0, n_pad - n), (0, 0)))
    target_b = jnp.pad(target_b, ((0, m_pad - m_valid), (0, 0)))
    labels2d = jnp.pad(target_indexs.astype(jnp.int32), (0, n_pad - n)).reshape(n_pad, 1)

    grid = (n_pad // bn, m_pad // bm)
    kernel = functools.partial(cirplus_bank_ce_kernel, tau=float(tau), m_valid=m_valid)

    per_row = pl.pallas_call(
        kernel,
        out_shape=jax.ShapeDtypeStruct((n_pad, 128), jnp.float32),
        grid_spec=pltpu.PrefetchScalarGridSpec(
            num_scalar_prefetch=0,
            grid=grid,
            in_specs=[
                pl.BlockSpec((bn, d), lambda i, j: (i, 0)),     # gathered refer rows
                pl.BlockSpec((bn, d), lambda i, j: (i, 0)),     # text feats
                pl.BlockSpec((bn, 1), lambda i, j: (i, 0)),     # CE labels
                pl.BlockSpec((bm, d), lambda i, j: (j, 0)),     # streamed target bank
            ],
            out_specs=pl.BlockSpec((bn, 128), lambda i, j: (i, 0)),
            scratch_shapes=[
                pltpu.VMEM((bn, d), jnp.bfloat16),   # scaled normalized query
                pltpu.VMEM((bn, 1), jnp.float32),    # running max
                pltpu.VMEM((bn, 1), jnp.float32),    # running sum(exp)
                pltpu.VMEM((bn, 1), jnp.float32),    # label logit
            ],
        ),
        compiler_params=pltpu.CompilerParams(
            dimension_semantics=("parallel", "arbitrary"),
            vmem_limit_bytes=32 * 1024 * 1024,       # fits v7x's 64 MiB with headroom
        ),
    )(refer_b, text_b, labels2d, target_b)

    # Masked mean over the real batch rows (padded rows excluded).
    return jnp.sum(per_row[:n, 0]) / n


def cirplus_forward(text_feats, refer_bank, target_bank, indexs, target_indexs,
                    refer_indexs=None, *, tau=0.01, plus=False):
    """Mirrors CIRPlus.forward -> {'bank_loss': ...} (text encoder handled outside)."""
    gather_idx = refer_indexs if (plus and refer_indexs is not None) else indexs
    loss = cirplus_bank_loss(text_feats, refer_bank, target_bank,
                             gather_idx, target_indexs, tau=tau)
    return {"bank_loss": loss}


def encode_text_standin(tokens, embed_table, proj):
    # TODO(synk): full CLIP text transformer encoder not reproduced; this is a
    # deterministic embedding-lookup + mean-pool + linear projection stand-in (glue).
    emb = embed_table[tokens]                 # (N, L, E)
    pooled = emb.mean(axis=1)                 # (N, E)
    return pooled @ proj                      # (N, D)


def l2_normalize(x, eps=1e-12):
    n = jnp.sqrt(jnp.sum(x * x, axis=-1, keepdims=True))
    return x / jnp.maximum(n, eps)


def reference_loss_f32(text_feats, refer_bank, target_bank, indexs, target_indexs, tau):
    # Pure-f32 JAX reference matching the PyTorch semantics.
    refer = refer_bank[indexs]
    query = l2_normalize(refer + text_feats)
    logits = query @ target_bank.T / tau
    lse = jax.scipy.special.logsumexp(logits, axis=-1)
    lbl = jnp.take_along_axis(logits, target_indexs[:, None], axis=-1)[:, 0]
    return jnp.mean(lse - lbl)


def reference_loss_bf16(text_feats, refer_bank, target_bank, indexs, target_indexs, tau):
    # Mirrors the kernel's numerics: bf16 MXU operands, f32 accumulation / stats.
    refer = refer_bank[indexs].astype(jnp.bfloat16).astype(jnp.float32)
    text = text_feats.astype(jnp.bfloat16).astype(jnp.float32)
    query = l2_normalize(refer + text)
    q_b = (query * (1.0 / tau)).astype(jnp.bfloat16)
    t_b = target_bank.astype(jnp.bfloat16)
    logits = jax.lax.dot_general(q_b, t_b, (((1,), (1,)), ((), ())),
                                 preferred_element_type=jnp.float32)
    lse = jax.scipy.special.logsumexp(logits, axis=-1)
    lbl = jnp.take_along_axis(logits, target_indexs[:, None], axis=-1)[:, 0]
    return jnp.mean(lse - lbl)


if __name__ == "__main__":
    key = jax.random.PRNGKey(0)
    k_refer, k_target, k_emb, k_proj, k_tok, k_idx, k_lbl = jax.random.split(key, 7)

    # Small CLIP-like synthetic shapes (D = clip.visual.output_dim).
    N = 8          # batch
    D = 512        # feature dim
    R = 512        # refer_bank rows
    M = 1000       # target_bank rows (deliberately not a multiple of the M block)
    L = 8          # token sequence length
    V = 100        # vocab size
    E = 64         # embedding dim of the text stand-in
    TAU = 0.01

    # target_bank is stored normalized, as in extract_bank_features.
    refer_bank = jax.random.normal(k_refer, (R, D), dtype=jnp.float32)
    target_bank = l2_normalize(jax.random.normal(k_target, (M, D), dtype=jnp.float32))

    embed_table = jax.random.normal(k_emb, (V, E), dtype=jnp.float32) * 0.02
    proj = jax.random.normal(k_proj, (E, D), dtype=jnp.float32) * 0.02
    tokens = jax.random.randint(k_tok, (N, L), 0, V, dtype=jnp.int32)

    indexs = jax.random.randint(k_idx, (N,), 0, R, dtype=jnp.int32)          # refer rows
    target_indexs = jax.random.randint(k_lbl, (N,), 0, M, dtype=jnp.int32)   # CE labels

    text_feats = encode_text_standin(tokens, embed_table, proj)

    loss = cirplus_forward(text_feats, refer_bank, target_bank, indexs,
                           target_indexs, refer_indexs=indexs, tau=TAU)["bank_loss"]
    loss = jax.block_until_ready(loss)

    ref_b = reference_loss_bf16(text_feats, refer_bank, target_bank,
                                indexs, target_indexs, TAU)
    ref_f = reference_loss_f32(text_feats, refer_bank, target_bank,
                               indexs, target_indexs, TAU)

    assert jnp.isfinite(loss), "kernel produced non-finite loss"
    assert jnp.allclose(loss, ref_b, rtol=1e-3, atol=1e-3), (loss, ref_b)
    assert jnp.allclose(loss, ref_f, rtol=1e-1, atol=1e-1), (loss, ref_f)

    print("KERNEL_OK")
</pallas_src>

<mosaic_0001>
module attributes {stable_mosaic.version = 11 : i64} {
  func.func @cirplus_bank_ce_kernel(%arg0: i32, %arg1: i32, %arg2: memref<16x512xbf16, #tpu.memory_space<vmem>>, %arg3: memref<16x512xbf16, #tpu.memory_space<vmem>>, %arg4: memref<16x1xi32, #tpu.memory_space<vmem>>, %arg5: memref<256x512xbf16, #tpu.memory_space<vmem>>, %arg6: memref<16x128xf32, #tpu.memory_space<vmem>>, %arg7: memref<16x512xbf16, #tpu.memory_space<vmem>>, %arg8: memref<16x1xf32, #tpu.memory_space<vmem>>, %arg9: memref<16x1xf32, #tpu.memory_space<vmem>>, %arg10: memref<16x1xf32, #tpu.memory_space<vmem>>) attributes {dimension_semantics = [#tpu.dimension_semantics<parallel>, #tpu.dimension_semantics<arbitrary>], iteration_bounds = array<i64: 1, 4>, scalar_prefetch = 0 : i64, scratch_operands = 4 : i64, tpu.core_type = #tpu.core_type<tc>, window_params = [{transform_indices = @transform_0, window_bounds = array<i64: 16, 512>}, {transform_indices = @transform_1, window_bounds = array<i64: 16, 512>}, {transform_indices = @transform_2, window_bounds = array<i64: 16, 1>}, {transform_indices = @transform_3, window_bounds = array<i64: 256, 512>}, {transform_indices = @transform_4, window_bounds = array<i64: 16, 128>}]} {
    %c0_i32 = arith.constant 0 : i32
    %0 = arith.cmpi eq, %arg1, %c0_i32 : i32
    %1 = arith.extui %0 : i1 to i32
    %c0_i32_0 = arith.constant 0 : i32
    %2 = arith.cmpi ne, %1, %c0_i32_0 : i32
    scf.if %2 {
      %c0_24 = arith.constant 0 : index
      %c0_25 = arith.constant 0 : index
      %43 = vector.load %arg2[%c0_24, %c0_25] : memref<16x512xbf16, #tpu.memory_space<vmem>>, vector<16x512xbf16>
      %44 = arith.extf %43 : vector<16x512xbf16> to vector<16x512xf32>
      %c0_26 = arith.constant 0 : index
      %c0_27 = arith.constant 0 : index
      %45 = vector.load %arg3[%c0_26, %c0_27] : memref<16x512xbf16, #tpu.memory_space<vmem>>, vector<16x512xbf16>
      %46 = arith.extf %45 : vector<16x512xbf16> to vector<16x512xf32>
      %47 = arith.addf %44, %46 : vector<16x512xf32>
      %48 = arith.mulf %47, %47 : vector<16x512xf32>
      %cst_28 = arith.constant dense<0.000000e+00> : vector<16xf32>
      %49 = vector.multi_reduction <add>, %48, %cst_28 [1] : vector<16x512xf32> to vector<16xf32>
      %50 = vector.shape_cast %49 : vector<16xf32> to vector<16x1xf32>
      %51 = math.sqrt %50 : vector<16x1xf32>
      %cst_29 = arith.constant 9.99999996E-13 : f32
      %52 = vector.broadcast %cst_29 : f32 to vector<16x1xf32>
      %53 = arith.maximumf %51, %52 : vector<16x1xf32>
      %54 = vector.broadcast %53 : vector<16x1xf32> to vector<16x512xf32>
      %55 = arith.divf %47, %54 : vector<16x512xf32>
      %cst_30 = arith.constant 1.000000e+02 : f32
      %56 = vector.broadcast %cst_30 : f32 to vector<16x512xf32>
      %57 = arith.mulf %55, %56 : vector<16x512xf32>
      %58 = arith.truncf %57 : vector<16x512xf32> to vector<16x512xbf16>
      %c0_31 = arith.constant 0 : index
      %c0_32 = arith.constant 0 : index
      %59 = vector.load %arg7[%c0_31, %c0_32] : memref<16x512xbf16, #tpu.memory_space<vmem>>, vector<16x512xbf16>
      tpu.vector_store %arg7[%c0_31, %c0_32], %58 {strides = array<i32>} : memref<16x512xbf16, #tpu.memory_space<vmem>>, vector<16x512xbf16>,
      %cst_33 = arith.constant -1.000000e+30 : f32
      %60 = vector.broadcast %cst_33 : f32 to vector<16x1xf32>
      %c0_34 = arith.constant 0 : index
      %c0_35 = arith.constant 0 : index
      %61 = vector.load %arg8[%c0_34, %c0_35] : memref<16x1xf32, #tpu.memory_space<vmem>>, vector<16x1xf32>
      tpu.vector_store %arg8[%c0_34, %c0_35], %60 {strides = array<i32>} : memref<16x1xf32, #tpu.memory_space<vmem>>, vector<16x1xf32>,
      %cst_36 = arith.constant 0.000000e+00 : f32
      %62 = vector.broadcast %cst_36 : f32 to vector<16x1xf32>
      %c0_37 = arith.constant 0 : index
      %c0_38 = arith.constant 0 : index
      %63 = vector.load %arg9[%c0_37, %c0_38] : memref<16x1xf32, #tpu.memory_space<vmem>>, vector<16x1xf32>
      tpu.vector_store %arg9[%c0_37, %c0_38], %62 {strides = array<i32>} : memref<16x1xf32, #tpu.memory_space<vmem>>, vector<16x1xf32>,
      %cst_39 = arith.constant 0.000000e+00 : f32
      %64 = vector.broadcast %cst_39 : f32 to vector<16x1xf32>
      %c0_40 = arith.constant 0 : index
      %c0_41 = arith.constant 0 : index
      %65 = vector.load %arg10[%c0_40, %c0_41] : memref<16x1xf32, #tpu.memory_space<vmem>>, vector<16x1xf32>
      tpu.vector_store %arg10[%c0_40, %c0_41], %64 {strides = array<i32>} : memref<16x1xf32, #tpu.memory_space<vmem>>, vector<16x1xf32>,
    } else {
    }
    %c0 = arith.constant 0 : index
    %c0_1 = arith.constant 0 : index
    %3 = vector.load %arg7[%c0, %c0_1] : memref<16x512xbf16, #tpu.memory_space<vmem>>, vector<16x512xbf16>
    %c0_2 = arith.constant 0 : index
    %c0_3 = arith.constant 0 : index
    %4 = vector.load %arg5[%c0_2, %c0_3] : memref<256x512xbf16, #tpu.memory_space<vmem>>, vector<256x512xbf16>
    %cst = arith.constant dense<0.000000e+00> : vector<16x256xf32>
    %5 = tpu.matmul %3, %4, %cst {dimension_numbers = #tpu.dot_dimension_numbers<[1], [1], [0], [0], [0, 0, 1, 0], [], []>} : vector<16x512xbf16>, vector<256x512xbf16>, vector<16x256xf32> -> vector<16x256xf32>
    %c256_i32 = arith.constant 256 : i32
    %6 = arith.muli %arg1, %c256_i32 : i32
    %7 = tpu.iota {dimensions = array<i32: 1>} : vector<16x256xi32>
    %8 = vector.broadcast %6 : i32 to vector<16x256xi32>
    %9 = arith.addi %8, %7 : vector<16x256xi32>
    %c1000_i32 = arith.constant 1000 : i32
    %10 = vector.broadcast %c1000_i32 : i32 to vector<16x256xi32>
    %11 = arith.cmpi slt, %9, %10 : vector<16x256xi32>
    %cst_4 = arith.constant -1.000000e+30 : f32
    %12 = vector.broadcast %cst_4 : f32 to vector<16x256xf32>
    %13 = arith.select %11, %5, %12 : vector<16x256xi1>, vector<16x256xf32>
    %c0_5 = arith.constant 0 : index
    %c0_6 = arith.constant 0 : index
    %14 = vector.load %arg8[%c0_5, %c0_6] : memref<16x1xf32, #tpu.memory_space<vmem>>, vector<16x1xf32>
    %cst_7 = arith.constant dense<0xFF800000> : vector<16xf32>
    %15 = vector.multi_reduction <maximumf>, %13, %cst_7 [1] : vector<16x256xf32> to vector<16xf32>
    %16 = vector.shape_cast %15 : vector<16xf32> to vector<16x1xf32>
    %17 = arith.maximumf %14, %16 : vector<16x1xf32>
    %18 = arith.subf %14, %17 : vector<16x1xf32>
    %19 = math.exp %18 : vector<16x1xf32>
    %c0_8 = arith.constant 0 : index
    %c0_9 = arith.constant 0 : index
    %20 = vector.load %arg9[%c0_8, %c0_9] : memref<16x1xf32, #tpu.memory_space<vmem>>, vector<16x1xf32>
    %21 = arith.mulf %19, %20 : vector<16x1xf32>
    %22 = vector.broadcast %17 : vector<16x1xf32> to vector<16x256xf32>
    %23 = arith.subf %13, %22 : vector<16x256xf32>
    %24 = math.exp %23 : vector<16x256xf32>
    %cst_10 = arith.constant dense<0.000000e+00> : vector<16xf32>
    %25 = vector.multi_reduction <add>, %24, %cst_10 [1] : vector<16x256xf32> to vector<16xf32>
    %26 = vector.shape_cast %25 : vector<16xf32> to vector<16x1xf32>
    %27 = arith.addf %21, %26 : vector<16x1xf32>
    %c0_11 = arith.constant 0 : index
    %c0_12 = arith.constant 0 : index
    %28 = vector.load %arg9[%c0_11, %c0_12] : memref<16x1xf32, #tpu.memory_space<vmem>>, vector<16x1xf32>
    tpu.vector_store %arg9[%c0_11, %c0_12], %27 {strides = array<i32>} : memref<16x1xf32, #tpu.memory_space<vmem>>, vector<16x1xf32>,
    %c0_13 = arith.constant 0 : index
    %c0_14 = arith.constant 0 : index
    %29 = vector.load %arg8[%c0_13, %c0_14] : memref<16x1xf32, #tpu.memory_space<vmem>>, vector<16x1xf32>
    tpu.vector_store %arg8[%c0_13, %c0_14], %17 {strides = array<i32>} : memref<16x1xf32, #tpu.memory_space<vmem>>, vector<16x1xf32>,
    %c0_15 = arith.constant 0 : index
    %c0_16 = arith.constant 0 : index
    %30 = vector.load %arg4[%c0_15, %c0_16] : memref<16x1xi32, #tpu.memory_space<vmem>>, vector<16x1xi32>
    %31 = vector.broadcast %30 : vector<16x1xi32> to vector<16x256xi32>
    %32 = arith.cmpi eq, %9, %31 : vector<16x256xi32>
    %c0_17 = arith.constant 0 : index
    %c0_18 = arith.constant 0 : index
    %33 = vector.load %arg10[%c0_17, %c0_18] : memref<16x1xf32, #tpu.memory_space<vmem>>, vector<16x1xf32>
    %cst_19 = arith.constant 0.000000e+00 : f32
    %34 = vector.broadcast %cst_19 : f32 to vector<16x256xf32>
    %35 = arith.select %32, %13, %34 : vector<16x256xi1>, vector<16x256xf32>
    %cst_20 = arith.constant dense<0.000000e+00> : vector<16xf32>
    %36 = vector.multi_reduction <add>, %35, %cst_20 [1] : vector<16x256xf32> to vector<16xf32>
    %37 = vector.shape_cast %36 : vector<16xf32> to vector<16x1xf32>
    %38 = arith.addf %33, %37 : vector<16x1xf32>
    %c0_21 = arith.constant 0 : index
    %c0_22 = arith.constant 0 : index
    %39 = vector.load %arg10[%c0_21, %c0_22] : memref<16x1xf32, #tpu.memory_space<vmem>>, vector<16x1xf32>
    tpu.vector_store %arg10[%c0_21, %c0_22], %38 {strides = array<i32>} : memref<16x1xf32, #tpu.memory_space<vmem>>, vector<16x1xf32>,
    %c3_i32 = arith.constant 3 : i32
    %40 = arith.cmpi eq, %arg1, %c3_i32 : i32
    %41 = arith.extui %40 : i1 to i32
    %c0_i32_23 = arith.constant 0 : i32
    %42 = arith.cmpi ne, %41, %c0_i32_23 : i32
    scf.if %42 {
      %c0_24 = arith.constant 0 : index
      %c0_25 = arith.constant 0 : index
      %43 = vector.load %arg8[%c0_24, %c0_25] : memref<16x1xf32, #tpu.memory_space<vmem>>, vector<16x1xf32>
      %c0_26 = arith.constant 0 : index
      %c0_27 = arith.constant 0 : index
      %44 = vector.load %arg9[%c0_26, %c0_27] : memref<16x1xf32, #tpu.memory_space<vmem>>, vector<16x1xf32>
      %45 = math.log %44 : vector<16x1xf32>
      %46 = arith.addf %43, %45 : vector<16x1xf32>
      %c0_28 = arith.constant 0 : index
      %c0_29 = arith.constant 0 : index
      %47 = vector.load %arg10[%c0_28, %c0_29] : memref<16x1xf32, #tpu.memory_space<vmem>>, vector<16x1xf32>
      %48 = arith.subf %46, %47 : vector<16x1xf32>
      %49 = vector.shape_cast %48 : vector<16x1xf32> to vector<16x1xf32>
      %50 = vector.broadcast %49 : vector<16x1xf32> to vector<16x128xf32>
      %c0_30 = arith.constant 0 : index
      %c0_31 = arith.constant 0 : index
      %51 = vector.load %arg6[%c0_30, %c0_31] : memref<16x128xf32, #tpu.memory_space<vmem>>, vector<16x128xf32>
      tpu.vector_store %arg6[%c0_30, %c0_31], %50 {strides = array<i32>} : memref<16x128xf32, #tpu.memory_space<vmem>>, vector<16x128xf32>,
    } else {
    }
    return
  }
  func.func @transform_0(%arg0: i32, %arg1: i32) -> (i32, i32) {
    %c0_i32 = arith.constant 0 : i32
    %c0_i32_0 = arith.constant 0 : i32
    return %arg0, %c0_i32 : i32, i32
  }
  func.func @transform_1(%arg0: i32, %arg1: i32) -> (i32, i32) {
    %c0_i32 = arith.constant 0 : i32
    %c0_i32_0 = arith.constant 0 : i32
    return %arg0, %c0_i32 : i32, i32
  }
  func.func @transform_2(%arg0: i32, %arg1: i32) -> (i32, i32) {
    %c0_i32 = arith.constant 0 : i32
    %c0_i32_0 = arith.constant 0 : i32
    return %arg0, %c0_i32 : i32, i32
  }
  func.func @transform_3(%arg0: i32, %arg1: i32) -> (i32, i32) {
    %c0_i32 = arith.constant 0 : i32
    %c0_i32_0 = arith.constant 0 : i32
    return %arg1, %c0_i32 : i32, i32
  }
  func.func @transform_4(%arg0: i32, %arg1: i32) -> (i32, i32) {
    %c0_i32 = arith.constant 0 : i32
    %c0_i32_0 = arith.constant 0 : i32
    return %arg0, %c0_i32 : i32, i32
  }
}

</mosaic_0001>

<bundles_post_ra>
// kernel: tpu_custom_call.1
= control target key start
LH: loop header
LB: loop body
LE: loop exit
PB: predicated region body
PF: predicated region fallthrough
CT: control target
= control target key end

     0   :  { %9 = vsyncpa [#allocation7], 0  ;;  %s2237_s0 = inlined_call_operand.hbm [shape: bf16[16,512], index: 0, kind: input, shape index: {}]   ;;  %s2238_s1 = inlined_call_operand.hbm [shape: bf16[16,512], index: 1, kind: input, shape index: {}]   ;;  %s2239_s2 = inlined_call_operand.vmem [shape: s32[16,1], index: 2, kind: input, shape index: {}]   ;;  %s2240_s3 = inlined_call_operand.hbm [shape: bf16[1024,512], index: 3, kind: input, shape index: {}]   ;;  %s2241_s4 = inlined_call_operand.hbm [shape: f32[16,128], index: 4, kind: output, shape index: {}]  }
   0x1   :  { %10 = vsyncpa [#allocation10], 0 }
   0x2   :  { %11 = vsyncpa [#allocation8], 0  ;;  %s1897_s15 = smov 0   ;;  %s1899_s16 = smov 0  }
   0x3   :  { %s1901_s17 = smov 0   ;;  %s1903_s18 = smov 0  }
   0x4   :  { %s1905_s19 = smov 0   ;;  %s1907_s20 = smov 0  }
   0x5 LB: > { %s1926_s21 = sadd.s32 4294967295, %s1859_s20   ;;  %p127_p0 = scmp.ne.s32.totalorder %s1843_s16, %s1839_s15  ;;  %s1859_s20 = sphi %s1907_s20, %s17_s20   ;;  %s1855_s19 = sphi %s1905_s19, %s2249_s19   ;;  %s1851_s18 = sphi %s1903_s18, %s2248_s18   ;;  %s1847_s17 = sphi %s1901_s17, %s2247_s17   ;;  %s1843_s16 = sphi %s1899_s16, %s2246_s16   ;;  %s1839_s15 = sphi %s1897_s15, %s2245_s15  }
   0x6   : > { %p128_p1 = scmp.eq.s32.totalorder %s1926_s21, 0  ;;  %p1198_p2 = scmp.ge.s32.totalorder %s1859_s20, 1 }
   0x7   : > { %p164_p3 = scmp.lt.s32.totalorder %s1859_s20, 5  ;;  %s179_s25 = sshll.u32 %s2237_s0, 4  ;;  %s180_s25 = int_to_ptr.hbm [resolvable:$true] %s179_s25 }
   0x8   : > { %p1934_p4 = por %p128_p1, %p127_p0  ;;  %s1861_s27 = smov [#allocation6]  }
   0x9   : > { %p1941_p5 = pnand %p1198_p2, %p164_p3  ;;  %s181_s28 = sshll.u32 %s1861_s27, 4  ;;  %s182_s28 = int_to_ptr.vmem [resolvable:$true] %s181_s28 }
   0xa   : > { %s197_s5 = sshll.u32 %s2238_s1, 4  ;;  %s1862_s6 = smov 256   ;;  %s198_s5 = int_to_ptr.hbm [resolvable:$true] %s197_s5 }
   0xb   : > { %p1574_p6 = pneg %p1941_p5  ;;  %s1863_s7 = smov 16  }
   0xc   : > { %s1864_s8 = smov [#allocation9]   ;;  %s26_s10 = sadd.s32 1, %s1855_s19 }
   0xd   : > { %p1575_p7 = pnand %p1574_p6, %p128_p1  ;;  %s199_s9 = sshll.u32 %s1864_s8, 4  ;;  %s200_s9 = int_to_ptr.vmem [resolvable:$true] %s199_s9 }
   0xe   : > { %p27_p8 = scmp.ge.s32.totalorder %s26_s10, 4  ;;  %p121_p9 = scmp.ne.s32.totalorder %s1847_s17, %s1843_s16 }
   0xf   : > { %1577 = dma.hbm_to_vmem [thread:$0]  (!%p1575_p7), %s180_s25, 512, %s182_s28, [#allocation7], %s1862_s6, %s1862_s6, %s1863_s7  }
  0x10   : > { %1580 = dma.hbm_to_vmem [thread:$0]  (!%p1575_p7), %s198_s5, 512, %s200_s9, [#allocation10], %s1862_s6, %s1862_s6, %s1863_s7  }
  0x11   : > { %s114_s11 = sadd.s32 1, %s1847_s17  ;;  %p122_p10 = scmp.eq.s32.totalorder %s1859_s20, 0 }
  0x12   : > { %s2251_s10 = smov (%p27_p8, %s26_s10), 0  ;;  %p1587_p12 = scmp.lt.s32.totalorder %s1859_s20, 4 }
  0x13   : > { %p1965_p11 = por %p122_p10, %p121_p9  ;;  %s111_s13 = ssub.s32 %s1855_s19, %s2251_s10 }
  0x14   : > { %s222_s14 = sand.u32 1, %s1859_s20   ;;  %p112_p13 = scmp.eq.s32.totalorder %s111_s13, 0 }
  0x15   : > { %s224_s15 = sand.u32 1, %s1847_s17   ;;  %s1491_s24 = sshll.u32 %s1855_s19, 9 }
  0x16   : > { %s1203_s23 = sshll.u32 %s224_s15, 9  ;;  %s232_s29 = scalar_lea.hbm %s2240_s3, %s1491_s24 }
  0x17   : > { %s1976_s25 = scalar_select %p112_p13, %s1847_s17, %s114_s11  }
  0x18   : > { %s233_s30 = sshll.u32 %s232_s29, 4  ;;  %s226_s5 = scalar_lea.vmem [#allocation11], %s1203_s23  ;;  %s234_s30 = int_to_ptr.hbm [resolvable:$true] %s233_s30 }
  0x19   : > { %s235_s8 = sshll.u32 %s226_s5, 4  ;;  %p1582_p0 = pnand %p1587_p12, %p1965_p11  ;;  %s236_s8 = int_to_ptr.vmem [resolvable:$true] %s235_s8 }
  0x1a   : > { %s223_s9 = scalar_lea.sflag [#allocation7], %s222_s14  ;;  %247 = sbr.rel (%p1941_p5) target bundleno = 1021 (0x3fd), region = 36 }
  0x1b   : > { %1584 = dma.hbm_to_vmem [thread:$0]  (!%p1582_p0), %s234_s30, 8192, %s236_s8, %s223_s9, %s1862_s6, %s1862_s6, %s1863_s7  }
  0x1f   : > { %1822 = dma.done.wait (%p128_p1), [#allocation7], 512  }
  0x20   : > { %1824 = vsyncadd (%p128_p1), [#allocation7], 4294966784 }
  0x21   : > { %1826 = dma.done.wait (%p128_p1), [#allocation10], 512  }
  0x22   : > { %1828 = vsyncadd (%p128_p1), [#allocation10], 4294966784  ;;  %s259_s11 = sand.u32 1, %s1926_s21   ;;  %s261_s6 = sand.u32 1, %s1843_s16  }
  0x23   : > { %s1210_s7 = sshll.u32 %s261_s6, 9  ;;  %s260_s26 = scalar_lea.sflag [#allocation7], %s259_s11 }
  0x24   : > { %s2000_s12 = scalar_lea.vmem [#allocation11], %s1210_s7 }
  0x25   : > { %1830 = dma.done.wait (%p1934_p4), %s260_s26, 8192  }
  0x26   : > { %1832 = vsyncadd (%p1934_p4), %s260_s26, 4294959104  ;;  %p1211_p2 = scmp.ne.s32.totalorder %s1851_s18, 0 }
  0x28   : > { %302 = sbr.rel (%p1211_p2) target bundleno = 232 (0xe8), region = 52 }
  0x2d   : > { %v303_v0 = vld [vmem:[#allocation6] sm:$0xff]  ;;  %v304_v1 = vld [vmem:[#allocation6 + $0x8] sm:$0xff]  ;;  %v305_v8 = vld [vmem:[#allocation6 + $0x10] sm:$0xff]  ;;  %vm431_vm2 = vcmask 7168  }
  0x2e   : > { %v315_v2 = vld [vmem:[#allocation9] sm:$0xff]  ;;  %v307_v3 = vunpack.c.l.bf16 %v303_v0  ;;  %v308_v4 = vunpack.c.h.bf16 %v303_v0  ;;  %v309_v5 = vunpack.c.l.bf16 %v304_v1  ;;  %v310_v6 = vunpack.c.h.bf16 %v304_v1  ;;  %v316_v7 = vld [vmem:[#allocation9 + $0x8] sm:$0xff]  ;;  %v306_v9 = vld [vmem:[#allocation6 + $0x18] sm:$0xff] }
  0x2f   : > { %v319_v10 = vunpack.c.l.bf16 %v315_v2  ;;  %v320_v11 = vunpack.c.h.bf16 %v315_v2  ;;  %v321_v12 = vunpack.c.l.bf16 %v316_v7  ;;  %v322_v13 = vunpack.c.h.bf16 %v316_v7  ;;  %v317_v14 = vld [vmem:[#allocation9 + $0x10] sm:$0xff]  ;;  %v318_v15 = vld [vmem:[#allocation9 + $0x18] sm:$0xff] }
  0x30   : > { %v311_v16 = vunpack.c.l.bf16 %v305_v8  ;;  %v312_v17 = vunpack.c.h.bf16 %v305_v8  ;;  %v313_v18 = vunpack.c.l.bf16 %v306_v9  ;;  %v314_v23 = vunpack.c.h.bf16 %v306_v9 }
  0x31   : > { %v2007_v19 = vadd.f32 %v319_v10, %v307_v3  ;;  %v2009_v20 = vadd.f32 %v320_v11, %v308_v4  ;;  %v2011_v21 = vadd.f32 %v321_v12, %v309_v5  ;;  %v2013_v22 = vadd.f32 %v322_v13, %v310_v6 }
  0x32   : > { %v323_v24 = vunpack.c.l.bf16 %v317_v14  ;;  %v324_v25 = vunpack.c.h.bf16 %v317_v14  ;;  %v325_v26 = vunpack.c.l.bf16 %v318_v15  ;;  %v326_v30 = vunpack.c.h.bf16 %v318_v15 }
  0x33   : > { %v335_v27 = vmul.f32 %v2007_v19, %v2007_v19  ;;  %v336_v28 = vmul.f32 %v2009_v20, %v2009_v20  ;;  %v337_v29 = vmul.f32 %v2011_v21, %v2011_v21  ;;  %v338_v34 = vmul.f32 %v2013_v22, %v2013_v22 }
  0x34   : > { %v2021_v31 = vadd.f32 %v323_v24, %v311_v16  ;;  %v2023_v32 = vadd.f32 %v324_v25, %v312_v17  ;;  %v2025_v33 = vadd.f32 %v325_v26, %v313_v18  ;;  %v2033_v39 = vadd.f32 %v326_v30, %v314_v23 }
  0x35   : > { %v343_v35 = vadd.f32 %v336_v28, %v335_v27  ;;  %v1865_v1 = vmov -1e+30   ;;  %v1866_v4 = vmov 0.0  }
  0x36   : > { %v339_v36 = vmul.f32 %v2021_v31, %v2021_v31  ;;  %v340_v37 = vmul.f32 %v2023_v32, %v2023_v32  ;;  %v341_v40 = vmul.f32 %v2025_v33, %v2025_v33  ;;  %v342_v43 = vmul.f32 %v2033_v39, %v2033_v39  ;;  %432 = vst.msk [vmem:[#allocation3] sm:$0xff] %vm431_vm2, %v1865_v1 }
  0x37   : > { %v344_v38 = vadd.f32 %v343_v35, %v337_v29  ;;  %433 = vst.msk [vmem:[#allocation3 + $0x8] sm:$0xff] %vm431_vm2, %v1865_v1 }
  0x38   : > { %v348_v41 = vadd.f32 %v340_v37, %v339_v36  ;;  %434 = vst.msk [vmem:[#allocation4] sm:$0xff] %vm431_vm2, %v1866_v4 }
  0x39   : > { %v345_v42 = vadd.f32 %v344_v38, %v338_v34  ;;  %435 = vst.msk [vmem:[#allocation4 + $0x8] sm:$0xff] %vm431_vm2, %v1866_v4 }
  0x3a   : > { %v349_v44 = vadd.f32 %v348_v41, %v341_v40  ;;  %436 = vst.msk [vmem:[#allocation5] sm:$0xff] %vm431_vm2, %v1866_v4 }
  0x3b   : > { %346 = vadd.xlane.f32.xlu0 %v345_v42  ;;  %437 = vst.msk [vmem:[#allocation5 + $0x8] sm:$0xff] %vm431_vm2, %v1866_v4 }
  0x3c   : > { %v350_v45 = vadd.f32 %v349_v44, %v342_v43 }
  0x43   : > { %351 = vadd.xlane.f32.xlu0 %v350_v45 }
  0xae   : > { %v347_v46 = vpop.xlane.xlu0 %346 }
  0xaf   : > { %1651 = vrsqrt.f32 %v347_v46  ;;  %vm360_vm0 = vcmp.eq.f32.partialorder %v347_v46, inf  ;;  %v363_v58 = vand.u32 2147483648, %v347_v46  ;;  %vm362_vm1 = vcmp.eq.f32.partialorder %v347_v46, 0.0 }
  0xb5   : > { %v1652_v47 = vpop.eup %1651 }
  0xb6   : > { %v354_v48 = vmul.f32 %v1652_v47, %v347_v46  ;;  %v352_v49 = vpop.xlane.xlu0 %351 }
  0xb7   : > { %1653 = vrsqrt.f32 %v352_v49  ;;  %vm372_vm3 = vcmp.eq.f32.partialorder %v352_v49, inf  ;;  %v375_v3 = vand.u32 2147483648, %v352_v49  ;;  %vm374_vm4 = vcmp.eq.f32.partialorder %v352_v49, 0.0 }
  0xb8   : > { %v355_v50 = vmul.f32 %v1652_v47, %v354_v48 }
  0xba   : > { %v356_v51 = vmul.f32 0.5, %v355_v50 }
  0xbc   : > { %v357_v52 = vsub.f32 1.5, %v356_v51 }
  0xbd   : > { %v1654_v53 = vpop.eup %1653 }
  0xbe   : > { %v358_v54 = vmul.f32 %v1652_v47, %v357_v52  ;;  %v366_v55 = vmul.f32 %v1654_v53, %v352_v49 }
  0xc0   : > { %v359_v56 = vmul.f32 %v358_v54, %v347_v46  ;;  %v367_v57 = vmul.f32 %v1654_v53, %v366_v55 }
  0xc2   : > { %v361_v59 = vsel %vm360_vm0, %v347_v46, %v359_v56  ;;  %v368_v60 = vmul.f32 0.5, %v367_v57 }
  0xc3   : > { %v364_v61 = vsel %vm362_vm1, %v363_v58, %v361_v59 }
  0xc4   : > { %v377_v62 = vmax.f32 %v364_v61, 1e-12  ;;  %v369_v63 = vsub.f32 1.5, %v368_v60 }
  0xc6   : > { %1655 = vrcp.f32 %v377_v62  ;;  %v370_v0 = vmul.f32 %v1654_v53, %v369_v63  ;;  %v390_v11 = vand.u32 2147483648, %v377_v62  ;;  %v388_v13 = vand.u32 2147483647, %v377_v62 }
  0xc7   : > { %vm384_vm6 = vweird.f32 %v377_v62 }
  0xc8   : > { %v371_v2 = vmul.f32 %v370_v0, %v352_v49  ;;  %v391_v15 = vor.u32 1.1754944e-38, %v390_v11  ;;  %vm389_vm8 = vcmp.eq.f32.partialorder %v388_v13, 8.507059e+37 }
  0xca   : > { %v373_v5 = vsel %vm372_vm3, %v352_v49, %v371_v2 }
  0xcb   : > { %v376_v7 = vsel %vm374_vm4, %v375_v3, %v373_v5 }
  0xcc   : > { %v1656_v6 = vpop.eup %1655  ;;  %v378_v9 = vmax.f32 %v376_v7, 1e-12 }
  0xcd   : > { %v380_v8 = vmul.f32 %v1656_v6, %v377_v62  ;;  %vm385_vm5 = vweird.f32 %v1656_v6 }
  0xce   : > { %1657 = vrcp.f32 %v378_v9  ;;  %vm386_vm7 = vmor %vm384_vm6, %vm385_vm5  ;;  %v408_v29 = vand.u32 2147483648, %v378_v9  ;;  %v406_v38 = vand.u32 2147483647, %v378_v9  ;;  %vm402_vm10 = vweird.f32 %v378_v9 }
  0xcf   : > { %v381_v10 = vsub.f32 1.0, %v380_v8 }
  0xd0   : > { %vm407_vm12 = vcmp.eq.f32.partialorder %v406_v38, 8.507059e+37 }
  0xd1   : > { %v382_v12 = vmul.f32 %v1656_v6, %v381_v10 }
  0xd3   : > { %v383_v14 = vadd.f32 %v1656_v6, %v382_v12 }
  0xd4   : > { %v1658_v16 = vpop.eup %1657 }
  0xd5   : > { %v387_v17 = vsel %vm386_vm7, %v1656_v6, %v383_v14  ;;  %v398_v23 = vmul.f32 %v1658_v16, %v378_v9  ;;  %vm403_vm9 = vweird.f32 %v1658_v16 }
  0xd6   : > { %v392_v18 = vsel %vm389_vm8, %v391_v15, %v387_v17  ;;  %vm404_vm11 = vmor %vm402_vm10, %vm403_vm9 }
  0xd7   : > { %v393_v24 = vmul.f32 %v392_v18, %v2007_v19  ;;  %v394_v25 = vmul.f32 %v392_v18, %v2009_v20  ;;  %v395_v26 = vmul.f32 %v392_v18, %v2011_v21  ;;  %v396_v27 = vmul.f32 %v392_v18, %v2013_v22 }
  0xd8   : > { %v399_v28 = vsub.f32 1.0, %v398_v23  ;;  %v409_v19 = vor.u32 1.1754944e-38, %v408_v29 }
  0xd9   : > { %v415_v30 = vmul.f32 100.0, %v393_v24  ;;  %v416_v34 = vmul.f32 100.0, %v394_v25  ;;  %v417_v35 = vmul.f32 100.0, %v395_v26  ;;  %v418_v36 = vmul.f32 100.0, %v396_v27 }
  0xda   : > { %v400_v37 = vmul.f32 %v1658_v16, %v399_v28 }
  0xdb   : > { %v423_v40 = vpack.c.bf16 %v416_v34, %v415_v30  ;;  %v424_v41 = vpack.c.bf16 %v418_v36, %v417_v35 }
  0xdc   : > { %v401_v42 = vadd.f32 %v1658_v16, %v400_v37 }
  0xdd   : > { %427 = vst [vmem:[#allocation2] sm:$0xff] %v423_v40 }
  0xde   : > { %428 = vst [vmem:[#allocation2 + $0x8] sm:$0xff] %v424_v41  ;;  %v405_v20 = vsel %vm404_vm11, %v1658_v16, %v401_v42 }
  0xdf   : > { %v410_v21 = vsel %vm407_vm12, %v409_v19, %v405_v20 }
  0xe0   : > { %v411_v22 = vmul.f32 %v410_v21, %v2021_v31  ;;  %v412_v43 = vmul.f32 %v410_v21, %v2023_v32  ;;  %v413_v44 = vmul.f32 %v410_v21, %v2025_v33  ;;  %v414_v45 = vmul.f32 %v410_v21, %v2033_v39 }
  0xe2   : > { %v419_v46 = vmul.f32 100.0, %v411_v22  ;;  %v420_v47 = vmul.f32 100.0, %v412_v43  ;;  %v421_v48 = vmul.f32 100.0, %v413_v44  ;;  %v422_v49 = vmul.f32 100.0, %v414_v45 }
  0xe4   : > { %v425_v50 = vpack.c.bf16 %v420_v47, %v419_v46  ;;  %v426_v51 = vpack.c.bf16 %v422_v49, %v421_v48 }
  0xe6   : > { %429 = vst [vmem:[#allocation2 + $0x10] sm:$0xff] %v425_v50 }
  0xe7   : > { %430 = vst [vmem:[#allocation2 + $0x18] sm:$0xff] %v426_v51 }
  0xe8 PF: > { %v1342_v31 = vld [vmem:[%s2000_s12 + $0xe0] sm:$0xf]  ;;  %v1526_v32 = vld [vmem:[%s2000_s12 + $0xec] sm:$0xf0]  ;;  %v1524_v33 = vld [vmem:[%s2000_s12 + $0xe4] sm:$0xf] }
  0xe9   : > { %v1343_v39 = vor.u32 %v1526_v32, %v1342_v31  ;;  %v1344_v52 = vld [vmem:[%s2000_s12 + $0xf0] sm:$0xf0]  ;;  %v1350_v53 = vld [vmem:[%s2000_s12 + $0xe8] sm:$0xf]  ;;  %v1527_v54 = vld [vmem:[%s2000_s12 + $0xf4] sm:$0xf0] }
  0xea   : > { %v1347_v55 = vor.u32 %v1524_v33, %v1344_v52  ;;  %v1351_v56 = vor.u32 %v1527_v54, %v1350_v53  ;;  %v1525_v57 = vld [vmem:[%s2000_s12 + $0xec] sm:$0xf]  ;;  %v1352_v58 = vld [vmem:[%s2000_s12 + $0xf8] sm:$0xf0]  ;;  %v1326_v60 = vld [vmem:[%s2000_s12 + $0xc0] sm:$0xf] }
  0xeb   : > { %846 = vmatpush.bf16.xpose.msra.mxu0 %v1343_v39  ;;  %v1355_v59 = vor.u32 %v1525_v57, %v1352_v58  ;;  %v1522_v61 = vld [vmem:[%s2000_s12 + $0xcc] sm:$0xf0]  ;;  %v1520_v62 = vld [vmem:[%s2000_s12 + $0xc4] sm:$0xf]  ;;  %v1328_v63 = vld [vmem:[%s2000_s12 + $0xd0] sm:$0xf0] }
  0xec   : > { %860 = vmatpush.bf16.xpose.msra.mxu1 %v1347_v55  ;;  %874 = vmatpush.bf16.xpose.msra.mxu2 %v1351_v56  ;;  %v1334_v0 = vld [vmem:[%s2000_s12 + $0xc8] sm:$0xf]  ;;  %v1523_v1 = vld [vmem:[%s2000_s12 + $0xd4] sm:$0xf0]  ;;  %v1521_v2 = vld [vmem:[%s2000_s12 + $0xcc] sm:$0xf]  ;;  %v1327_v4 = vor.u32 %v1522_v61, %v1326_v60  ;;  %v1331_v5 = vor.u32 %v1520_v62, %v1328_v63 }
  0xed   : > { %888 = vmatpush.bf16.xpose.msra.mxu3 %v1355_v59  ;;  %v1336_v3 = vld [vmem:[%s2000_s12 + $0xd8] sm:$0xf0]  ;;  %v1335_v6 = vor.u32 %v1523_v1, %v1334_v0  ;;  %v1310_v8 = vld [vmem:[%s2000_s12 + $0xa0] sm:$0xf]  ;;  %v1518_v9 = vld [vmem:[%s2000_s12 + $0xac] sm:$0xf0] }
  0xee   : > { %v1339_v7 = vor.u32 %v1521_v2, %v1336_v3  ;;  %v1516_v10 = vld [vmem:[%s2000_s12 + $0xa4] sm:$0xf]  ;;  %v1312_v11 = vld [vmem:[%s2000_s12 + $0xb0] sm:$0xf0]  ;;  %v1318_v12 = vld [vmem:[%s2000_s12 + $0xa8] sm:$0xf]  ;;  %v1311_v16 = vor.u32 %v1518_v9, %v1310_v8 }
  0xef   : > { %v1519_v13 = vld [vmem:[%s2000_s12 + $0xb4] sm:$0xf0]  ;;  %v1517_v14 = vld [vmem:[%s2000_s12 + $0xac] sm:$0xf]  ;;  %v1320_v15 = vld [vmem:[%s2000_s12 + $0xb8] sm:$0xf0]  ;;  %v1315_v17 = vor.u32 %v1516_v10, %v1312_v11 }
  0xf0   : > { %v1319_v18 = vor.u32 %v1519_v13, %v1318_v12  ;;  %v1323_v23 = vor.u32 %v1517_v14, %v1320_v15  ;;  %v1294_v24 = vld [vmem:[%s2000_s12 + $0x80] sm:$0xf]  ;;  %v1514_v25 = vld [vmem:[%s2000_s12 + $0x8c] sm:$0xf0]  ;;  %v1512_v26 = vld [vmem:[%s2000_s12 + $0x84] sm:$0xf] }
  0xf1   : > { %v1296_v27 = vld [vmem:[%s2000_s12 + $0x90] sm:$0xf0]  ;;  %v1302_v28 = vld [vmem:[%s2000_s12 + $0x88] sm:$0xf]  ;;  %v1515_v29 = vld [vmem:[%s2000_s12 + $0x94] sm:$0xf0]  ;;  %v1295_v35 = vor.u32 %v1514_v25, %v1294_v24 }
  0xf2   : > { %v1513_v30 = vld [vmem:[%s2000_s12 + $0x8c] sm:$0xf]  ;;  %v1304_v34 = vld [vmem:[%s2000_s12 + $0x98] sm:$0xf0]  ;;  %v1299_v36 = vor.u32 %v1512_v26, %v1296_v27  ;;  %v1303_v37 = vor.u32 %v1515_v29, %v1302_v28  ;;  %v1278_v40 = vld [vmem:[%s2000_s12 + $0x60] sm:$0xf] }
  0xf3   : > { %847 = vmatpush.bf16.xpose.msra.mxu0 %v1327_v4  ;;  %v1307_v38 = vor.u32 %v1513_v30, %v1304_v34  ;;  %v1510_v41 = vld [vmem:[%s2000_s12 + $0x6c] sm:$0xf0]  ;;  %v1508_v42 = vld [vmem:[%s2000_s12 + $0x64] sm:$0xf]  ;;  %v1280_v19 = vld [vmem:[%s2000_s12 + $0x70] sm:$0xf0] }
  0xf4   : > { %861 = vmatpush.bf16.xpose.msra.mxu1 %v1331_v5  ;;  %875 = vmatpush.bf16.xpose.msra.mxu2 %v1335_v6  ;;  %v1286_v20 = vld [vmem:[%s2000_s12 + $0x68] sm:$0xf]  ;;  %v1511_v21 = vld [vmem:[%s2000_s12 + $0x74] sm:$0xf0]  ;;  %v1509_v22 = vld [vmem:[%s2000_s12 + $0x6c] sm:$0xf]  ;;  %v1279_v44 = vor.u32 %v1510_v41, %v1278_v40  ;;  %v1283_v45 = vor.u32 %v1508_v42, %v1280_v19 }
  0xf5   : > { %889 = vmatpush.bf16.xpose.msra.mxu3 %v1339_v7  ;;  %v1288_v43 = vld [vmem:[%s2000_s12 + $0x78] sm:$0xf0]  ;;  %v1287_v46 = vor.u32 %v1511_v21, %v1286_v20  ;;  %v1262_v48 = vld [vmem:[%s2000_s12 + $0x40] sm:$0xf]  ;;  %v1506_v49 = vld [vmem:[%s2000_s12 + $0x4c] sm:$0xf0] }
  0xf6   : > { %v1291_v47 = vor.u32 %v1509_v22, %v1288_v43  ;;  %v1504_v50 = vld [vmem:[%s2000_s12 + $0x44] sm:$0xf]  ;;  %v1264_v51 = vld [vmem:[%s2000_s12 + $0x50] sm:$0xf0]  ;;  %v1270_v31 = vld [vmem:[%s2000_s12 + $0x48] sm:$0xf]  ;;  %v1263_v52 = vor.u32 %v1506_v49, %v1262_v48 }
  0xf7   : > { %v1507_v32 = vld [vmem:[%s2000_s12 + $0x54] sm:$0xf0]  ;;  %v1505_v33 = vld [vmem:[%s2000_s12 + $0x4c] sm:$0xf]  ;;  %v1272_v39 = vld [vmem:[%s2000_s12 + $0x58] sm:$0xf0]  ;;  %v1267_v53 = vor.u32 %v1504_v50, %v1264_v51 }
  0xf8   : > { %v1271_v54 = vor.u32 %v1507_v32, %v1270_v31  ;;  %v1275_v55 = vor.u32 %v1505_v33, %v1272_v39  ;;  %v1246_v56 = vld [vmem:[%s2000_s12 + $0x20] sm:$0xf]  ;;  %v1502_v57 = vld [vmem:[%s2000_s12 + $0x2c] sm:$0xf0]  ;;  %v1500_v58 = vld [vmem:[%s2000_s12 + $0x24] sm:$0xf] }
  0xf9   : > { %v1248_v59 = vld [vmem:[%s2000_s12 + $0x30] sm:$0xf0]  ;;  %v1254_v60 = vld [vmem:[%s2000_s12 + $0x28] sm:$0xf]  ;;  %v1503_v61 = vld [vmem:[%s2000_s12 + $0x34] sm:$0xf0]  ;;  %v1247_v0 = vor.u32 %v1502_v57, %v1246_v56 }
  0xfa   : > { %v1501_v62 = vld [vmem:[%s2000_s12 + $0x2c] sm:$0xf]  ;;  %v1256_v63 = vld [vmem:[%s2000_s12 + $0x38] sm:$0xf0]  ;;  %v1251_v1 = vor.u32 %v1500_v58, %v1248_v59  ;;  %v1255_v2 = vor.u32 %v1503_v61, %v1254_v60  ;;  %v1230_v4 = vld [vmem:[%s2000_s12] sm:$0xf] }
  0xfb   : > { %848 = vmatpush.bf16.xpose.msra.mxu0 %v1311_v16  ;;  %v1259_v3 = vor.u32 %v1501_v62, %v1256_v63  ;;  %v1498_v5 = vld [vmem:[%s2000_s12 + $0xc] sm:$0xf0]  ;;  %v1496_v6 = vld [vmem:[%s2000_s12 + $0x4] sm:$0xf]  ;;  %v1232_v7 = vld [vmem:[%s2000_s12 + $0x10] sm:$0xf0] }
  0xfc   : > { %862 = vmatpush.bf16.xpose.msra.mxu1 %v1315_v17  ;;  %876 = vmatpush.bf16.xpose.msra.mxu2 %v1319_v18  ;;  %v1238_v8 = vld [vmem:[%s2000_s12 + $0x8] sm:$0xf]  ;;  %v1499_v9 = vld [vmem:[%s2000_s12 + $0x14] sm:$0xf0]  ;;  %v1497_v10 = vld [vmem:[%s2000_s12 + $0xc] sm:$0xf]  ;;  %v1231_v15 = vor.u32 %v1498_v5, %v1230_v4 }
  0xfd   : > { %890 = vmatpush.bf16.xpose.msra.mxu3 %v1323_v23  ;;  %v1240_v11 = vld [vmem:[%s2000_s12 + $0x18] sm:$0xf0]  ;;  %v1470_v12 = vld [vmem:[%s2000_s12 + $0x1e0] sm:$0xf]  ;;  %v1558_v13 = vld [vmem:[%s2000_s12 + $0x1ec] sm:$0xf0]  ;;  %v1235_v23 = vor.u32 %v1496_v6, %v1232_v7  ;;  %v1239_v24 = vor.u32 %v1499_v9, %v1238_v8 }
  0xfe   : > { %v1556_v14 = vld [vmem:[%s2000_s12 + $0x1e4] sm:$0xf]  ;;  %v1472_v16 = vld [vmem:[%s2000_s12 + $0x1f0] sm:$0xf0]  ;;  %v1478_v17 = vld [vmem:[%s2000_s12 + $0x1e8] sm:$0xf]  ;;  %v1243_v27 = vor.u32 %v1497_v10, %v1240_v11  ;;  %v1471_v28 = vor.u32 %v1558_v13, %v1470_v12 }
  0xff   : > { %v1559_v18 = vld [vmem:[%s2000_s12 + $0x1f4] sm:$0xf0]  ;;  %v1557_v25 = vld [vmem:[%s2000_s12 + $0x1ec] sm:$0xf]  ;;  %v1480_v26 = vld [vmem:[%s2000_s12 + $0x1f8] sm:$0xf0]  ;;  %v1475_v29 = vor.u32 %v1556_v14, %v1472_v16 }
 0x100   : > { %v1479_v30 = vor.u32 %v1559_v18, %v1478_v17  ;;  %v1483_v34 = vor.u32 %v1557_v25, %v1480_v26  ;;  %v1462_v40 = vld [vmem:[%s2000_s12 + $0x1c8] sm:$0xf]  ;;  %v1555_v41 = vld [vmem:[%s2000_s12 + $0x1d4] sm:$0xf0]  ;;  %v1553_v20 = vld [vmem:[%s2000_s12 + $0x1cc] sm:$0xf] }
 0x101   : > { %v1222_v42 = vld [vmem:[#allocation2 + $0x8] sm:$0xf]  ;;  %v1495_v19 = vld [vmem:[#allocation2 + $0x14] sm:$0xf0]  ;;  %v1464_v21 = vld [vmem:[%s2000_s12 + $0x1d8] sm:$0xf0] }
 0x102   : > { %v2133_v22 = vor.u32 %v1495_v19, %v1222_v42  ;;  %v1550_v48 = vld [vmem:[%s2000_s12 + $0x1ac] sm:$0xf0]  ;;  %v1548_v49 = vld [vmem:[%s2000_s12 + $0x1a4] sm:$0xf]  ;;  %v1440_v50 = vld [vmem:[%s2000_s12 + $0x1b0] sm:$0xf0] }
 0x103   : > { %849 = vmatpush.bf16.xpose.msra.mxu0 %v1295_v35  ;;  %v1454_v35 = vld [vmem:[%s2000_s12 + $0x1c0] sm:$0xf]  ;;  %v1446_v51 = vld [vmem:[%s2000_s12 + $0x1a8] sm:$0xf]  ;;  %v1551_v31 = vld [vmem:[%s2000_s12 + $0x1b4] sm:$0xf0]  ;;  %v1443_v61 = vor.u32 %v1548_v49, %v1440_v50 }
 0x104   : > { %863 = vmatpush.bf16.xpose.msra.mxu1 %v1299_v36  ;;  %877 = vmatpush.bf16.xpose.msra.mxu2 %v1303_v37  ;;  %v1554_v36 = vld [vmem:[%s2000_s12 + $0x1cc] sm:$0xf0]  ;;  %v1552_v37 = vld [vmem:[%s2000_s12 + $0x1c4] sm:$0xf]  ;;  %v1493_v32 = vld [vmem:[#allocation2 + $0xc] sm:$0xf]  ;;  %v1447_v62 = vor.u32 %v1551_v31, %v1446_v51 }
 0x105   : > { %891 = vmatpush.bf16.xpose.msra.mxu3 %v1307_v38  ;;  %v1456_v38 = vld [vmem:[%s2000_s12 + $0x1d0] sm:$0xf0]  ;;  %v1455_v43 = vor.u32 %v1554_v36, %v1454_v35  ;;  %v1224_v33 = vld [vmem:[#allocation2 + $0x18] sm:$0xf0]  ;;  %v1448_v56 = vld [vmem:[%s2000_s12 + $0x1b8] sm:$0xf0] }
 0x106   : > { %v2142_v39 = vor.u32 %v1493_v32, %v1224_v33  ;;  %v1216_v58 = vld [vmem:[#allocation2 + $0x10] sm:$0xf0]  ;;  %v1430_v4 = vld [vmem:[%s2000_s12 + $0x188] sm:$0xf]  ;;  %v1547_v5 = vld [vmem:[%s2000_s12 + $0x194] sm:$0xf0] }
 0x107   : > { %v1545_v6 = vld [vmem:[%s2000_s12 + $0x18c] sm:$0xf]  ;;  %v1432_v7 = vld [vmem:[%s2000_s12 + $0x198] sm:$0xf0]  ;;  %v1431_v10 = vor.u32 %v1547_v5, %v1430_v4  ;;  %v1406_v12 = vld [vmem:[%s2000_s12 + $0x160] sm:$0xf] }
 0x108   : > { %v1435_v11 = vor.u32 %v1545_v6, %v1432_v7  ;;  %v1542_v13 = vld [vmem:[%s2000_s12 + $0x16c] sm:$0xf0]  ;;  %v1540_v14 = vld [vmem:[%s2000_s12 + $0x164] sm:$0xf]  ;;  %v1414_v16 = vld [vmem:[%s2000_s12 + $0x168] sm:$0xf] }
 0x109   : > { %v1543_v17 = vld [vmem:[%s2000_s12 + $0x174] sm:$0xf0]  ;;  %v1541_v18 = vld [vmem:[%s2000_s12 + $0x16c] sm:$0xf]  ;;  %v1392_v35 = vld [vmem:[%s2000_s12 + $0x150] sm:$0xf0] }
 0x10a   : > { %v1415_v26 = vor.u32 %v1543_v17, %v1414_v16  ;;  %v1398_v36 = vld [vmem:[%s2000_s12 + $0x148] sm:$0xf]  ;;  %v1535_v49 = vld [vmem:[%s2000_s12 + $0x134] sm:$0xf0]  ;;  %v1533_v50 = vld [vmem:[%s2000_s12 + $0x12c] sm:$0xf] }
 0x10b   : > { %850 = vmatpush.bf16.xpose.msra.mxu0 %v1279_v44  ;;  %v1459_v44 = vor.u32 %v1552_v37, %v1456_v38  ;;  %v1539_v37 = vld [vmem:[%s2000_s12 + $0x154] sm:$0xf0]  ;;  %v1867_v38 = vmov 0   ;;  %v1384_v51 = vld [vmem:[%s2000_s12 + $0x138] sm:$0xf0]  ;;  %s1484_s23 = sshll.u32 %s1851_s18, 8 }
 0x10c   : > { %864 = vmatpush.bf16.xpose.msra.mxu1 %v1283_v45  ;;  %878 = vmatpush.bf16.xpose.msra.mxu2 %v1287_v46  ;;  %v1463_v45 = vor.u32 %v1555_v41, %v1462_v40  ;;  %v1467_v46 = vor.u32 %v1553_v20, %v1464_v21  ;;  %v1537_v40 = vld [vmem:[%s2000_s12 + $0x14c] sm:$0xf]  ;;  %v1400_v41 = vld [vmem:[%s2000_s12 + $0x158] sm:$0xf0]  ;;  %v1399_v20 = vor.u32 %v1539_v37, %v1398_v36  ;;  %vm1021_vm3 = vcmask 7168   ;;  %p1485_p1 = scmp.ne.s32.totalorder %s1851_s18, 3 }
 0x10d   : > { %892 = vmatpush.bf16.xpose.msra.mxu3 %v1291_v47  ;;  %v1438_v47 = vld [vmem:[%s2000_s12 + $0x1a0] sm:$0xf]  ;;  %1660 = vset.pattern.permute.xlu2 %v1867_v38  ;;  %v1403_v21 = vor.u32 %v1537_v40, %v1400_v41 }
 0x10e   : > { %v1439_v59 = vor.u32 %v1550_v48, %v1438_v47  ;;  %1659 = vset.pattern.permute.xlu1 %v1867_v38  ;;  %1661 = vset.pattern.permute.xlu0 %v1867_v38  ;;  %v1376_v47 = vld [vmem:[%s2000_s12 + $0x130] sm:$0xf0]  ;;  %v1382_v48 = vld [vmem:[%s2000_s12 + $0x128] sm:$0xf] }
 0x10f   : > { %v1383_v33 = vor.u32 %v1535_v49, %v1382_v48 }
 0x113   : > { %851 = vmatpush.bf16.xpose.msra.mxu0 %v1263_v52  ;;  %v1214_v52 = vld [vmem:[#allocation2] sm:$0xf] }
 0x114   : > { %865 = vmatpush.bf16.xpose.msra.mxu1 %v1267_v53  ;;  %879 = vmatpush.bf16.xpose.msra.mxu2 %v1271_v54  ;;  %v1494_v53 = vld [vmem:[#allocation2 + $0xc] sm:$0xf0]  ;;  %v1492_v54 = vld [vmem:[#allocation2 + $0x4] sm:$0xf] }
 0x115   : > { %893 = vmatpush.bf16.xpose.msra.mxu3 %v1275_v55  ;;  %v1549_v55 = vld [vmem:[%s2000_s12 + $0x1ac] sm:$0xf]  ;;  %v2146_v57 = vor.u32 %v1494_v53, %v1214_v52  ;;  %v2149_v60 = vor.u32 %v1492_v54, %v1216_v58  ;;  %v1387_v52 = vor.u32 %v1533_v50, %v1384_v51  ;;  %v1358_v53 = vld [vmem:[%s2000_s12 + $0x100] sm:$0xf]  ;;  %v1530_v54 = vld [vmem:[%s2000_s12 + $0x10c] sm:$0xf0] }
 0x116   : > { %v1451_v63 = vor.u32 %v1549_v55, %v1448_v56  ;;  %v1528_v55 = vld [vmem:[%s2000_s12 + $0x104] sm:$0xf]  ;;  %v1360_v56 = vld [vmem:[%s2000_s12 + $0x110] sm:$0xf0]  ;;  %v1366_v58 = vld [vmem:[%s2000_s12 + $0x108] sm:$0xf] }
 0x11b   : > { %852 = vmatpush.bf16.xpose.msra.mxu0 %v1247_v0  ;;  %v1422_v0 = vld [vmem:[%s2000_s12 + $0x180] sm:$0xf] }
 0x11c   : > { %866 = vmatpush.bf16.xpose.msra.mxu1 %v1251_v1  ;;  %880 = vmatpush.bf16.xpose.msra.mxu2 %v1255_v2  ;;  %v1546_v1 = vld [vmem:[%s2000_s12 + $0x18c] sm:$0xf0]  ;;  %v1544_v2 = vld [vmem:[%s2000_s12 + $0x184] sm:$0xf] }
 0x11d   : > { %894 = vmatpush.bf16.xpose.msra.mxu3 %v1259_v3  ;;  %v1424_v3 = vld [vmem:[%s2000_s12 + $0x190] sm:$0xf0]  ;;  %v1423_v8 = vor.u32 %v1546_v1, %v1422_v0  ;;  %v1363_v0 = vor.u32 %v1528_v55, %v1360_v56  ;;  %v972_v56 = vld [vmem:[#allocation3 + $0x8] sm:$0xff] }
 0x11e   : > { %v1427_v9 = vor.u32 %v1544_v2, %v1424_v3 }
 0x123   : > { %853 = vmatpush.bf16.xpose.msra.mxu0 %v1231_v15  ;;  %v1408_v15 = vld [vmem:[%s2000_s12 + $0x170] sm:$0xf0] }
 0x124   : > { %867 = vmatpush.bf16.xpose.msra.mxu1 %v1235_v23  ;;  %881 = vmatpush.bf16.xpose.msra.mxu2 %v1239_v24  ;;  %v1416_v23 = vld [vmem:[%s2000_s12 + $0x178] sm:$0xf0]  ;;  %v1407_v24 = vor.u32 %v1542_v13, %v1406_v12  ;;  %v1411_v25 = vor.u32 %v1540_v14, %v1408_v15  ;;  %v962_v13 = vstv %s1484_s23 }
 0x125   : > { %895 = vmatpush.bf16.xpose.msra.mxu3 %v1243_v27  ;;  %v1419_v27 = vor.u32 %v1541_v18, %v1416_v23 }
 0x12a   : > { %854 = vmatmul.bf16.vlgmr.msra.gmra.mxu0 %v2146_v57 }
 0x12b   : > { %902 = vmatpush.bf16.xpose.msrb.mxu0 %v1471_v28  ;;  %882 = vmatmul.bf16.vlgmr.msra.gmra.mxu2 %v2133_v22  ;;  %v1390_v28 = vld [vmem:[%s2000_s12 + $0x140] sm:$0xf] }
 0x12c   : > { %916 = vmatpush.bf16.xpose.msrb.mxu1 %v1475_v29  ;;  %930 = vmatpush.bf16.xpose.msrb.mxu2 %v1479_v30  ;;  %v1538_v29 = vld [vmem:[%s2000_s12 + $0x14c] sm:$0xf0]  ;;  %v1536_v30 = vld [vmem:[%s2000_s12 + $0x144] sm:$0xf] }
 0x12d   : > { %944 = vmatpush.bf16.xpose.msrb.mxu3 %v1483_v34  ;;  %868 = vmatmul.bf16.vlgmr.msra.gmra.mxu1 %v2149_v60  ;;  %v1026_v34 = vld [vmem:[%s2239_s2] sm:$0xff]  ;;  %v1391_v42 = vor.u32 %v1538_v29, %v1390_v28  ;;  %v1395_v19 = vor.u32 %v1536_v30, %v1392_v35 }
 0x12e   : > { %896 = vmatmul.bf16.vlgmr.msra.gmra.mxu3 %v2142_v39  ;;  %1029 = vperm.xlu2 %1660, %v1026_v34  }
 0x133   : > { %903 = vmatpush.bf16.xpose.msrb.mxu0 %v1455_v43  ;;  %v1027_v43 = vld [vmem:[%s2239_s2 + $0x8] sm:$0xff] }
 0x134   : > { %917 = vmatpush.bf16.xpose.msrb.mxu1 %v1459_v44  ;;  %931 = vmatpush.bf16.xpose.msrb.mxu2 %v1463_v45  ;;  %v1374_v44 = vld [vmem:[%s2000_s12 + $0x120] sm:$0xf]  ;;  %v1534_v45 = vld [vmem:[%s2000_s12 + $0x12c] sm:$0xf0] }
 0x135   : > { %945 = vmatpush.bf16.xpose.msrb.mxu3 %v1467_v46  ;;  %v1532_v46 = vld [vmem:[%s2000_s12 + $0x124] sm:$0xf]  ;;  %v1375_v31 = vor.u32 %v1534_v45, %v1374_v44 }
 0x136   : > { %1032 = vperm.xlu2 %1660, %v1027_v43   ;;  %v1379_v32 = vor.u32 %v1532_v46, %v1376_v47 }
 0x13b   : > { %904 = vmatpush.bf16.xpose.msrb.mxu0 %v1439_v59  ;;  %v1531_v59 = vld [vmem:[%s2000_s12 + $0x114] sm:$0xf0] }
 0x13c   : > { %918 = vmatpush.bf16.xpose.msrb.mxu1 %v1443_v61  ;;  %932 = vmatpush.bf16.xpose.msrb.mxu2 %v1447_v62  ;;  %v1529_v61 = vld [vmem:[%s2000_s12 + $0x10c] sm:$0xf]  ;;  %v1368_v62 = vld [vmem:[%s2000_s12 + $0x118] sm:$0xf0]  ;;  %v1367_v1 = vor.u32 %v1531_v59, %v1366_v58 }
 0x13d   : > { %946 = vmatpush.bf16.xpose.msrb.mxu3 %v1451_v63  ;;  %v1359_v63 = vor.u32 %v1530_v54, %v1358_v53  ;;  %v1371_v2 = vor.u32 %v1529_v61, %v1368_v62 }
 0x143   : > { %905 = vmatpush.bf16.xpose.msrb.mxu0 %v1423_v8 }
 0x144   : > { %919 = vmatpush.bf16.xpose.msrb.mxu1 %v1427_v9  ;;  %933 = vmatpush.bf16.xpose.msrb.mxu2 %v1431_v10  ;;  %v959_v9 = vlaneseq }
 0x145   : > { %947 = vmatpush.bf16.xpose.msrb.mxu3 %v1435_v11 }
 0x146   : > { %v960_v11 = vand.u32 127, %v959_v9 }
 0x14b   : > { %906 = vmatpush.bf16.xpose.msrb.mxu0 %v1407_v24 }
 0x14c   : > { %920 = vmatpush.bf16.xpose.msrb.mxu1 %v1411_v25  ;;  %934 = vmatpush.bf16.xpose.msrb.mxu2 %v1415_v26 }
 0x14d   : > { %948 = vmatpush.bf16.xpose.msrb.mxu3 %v1419_v27 }
 0x153   : > { %907 = vmatpush.bf16.xpose.msrb.mxu0 %v1391_v42 }
 0x154   : > { %921 = vmatpush.bf16.xpose.msrb.mxu1 %v1395_v19  ;;  %935 = vmatpush.bf16.xpose.msrb.mxu2 %v1399_v20 }
 0x155   : > { %949 = vmatpush.bf16.xpose.msrb.mxu3 %v1403_v21 }
 0x15b   : > { %908 = vmatpush.bf16.xpose.msrb.mxu0 %v1375_v31  ;;  %v971_v31 = vld [vmem:[#allocation3] sm:$0xff] }
 0x15c   : > { %922 = vmatpush.bf16.xpose.msrb.mxu1 %v1379_v32  ;;  %936 = vmatpush.bf16.xpose.msrb.mxu2 %v1383_v33  ;;  %v1038_v32 = vld [vmem:[#allocation5] sm:$0xff] }
 0x15d   : > { %950 = vmatpush.bf16.xpose.msrb.mxu3 %v1387_v52 }
 0x163   : > { %909 = vmatpush.bf16.xpose.msrb.mxu0 %v1359_v63 }
 0x164   : > { %923 = vmatpush.bf16.xpose.msrb.mxu1 %v1363_v0  ;;  %937 = vmatpush.bf16.xpose.msrb.mxu2 %v1367_v1 }
 0x165   : > { %951 = vmatpush.bf16.xpose.msrb.mxu3 %v1371_v2 }
 0x16a   : > { %910 = vmatmul.bf16.vlgmr.msrb.gmra.mxu0 %v2146_v57  ;;  %v961_v57 = vadd.s32 128, %v960_v11 }
 0x16b   : > { %924 = vmatmul.bf16.vlgmr.msrb.gmra.mxu1 %v2149_v60  ;;  %938 = vmatmul.bf16.vlgmr.msrb.gmra.mxu2 %v2133_v22  ;;  %v963_v22 = vadd.s32 %v962_v13, %v960_v11 }
 0x16c   : > { %952 = vmatmul.bf16.vlgmr.msrb.gmra.mxu3 %v2142_v39  ;;  %v964_v18 = vadd.s32 %v962_v13, %v961_v57 }
 0x16d   : > { %vm965_vm13 = vcmp.lt.s32.totalorder %v963_v22, 1000 }
 0x16e   : > { %vm966_vm15 = vcmp.lt.s32.totalorder %v964_v18, 1000 }
 0x188   : > { %v1030_v39 = vpop.permute.xlu2 %1029 }
 0x189   : > { %vm1034_vm14 = vcmp.eq.s32.totalorder %v963_v22, %v1030_v39  ;;  %vm1035_vm0 = vcmp.eq.s32.totalorder %v964_v18, %v1030_v39 }
 0x190   : > { %v1033_v20 = vpop.permute.xlu2 %1032 }
 0x191   : > { %vm1036_vm1 = vcmp.eq.s32.totalorder %v963_v22, %v1033_v20  ;;  %vm1037_vm2 = vcmp.eq.s32.totalorder %v964_v18, %v1033_v20  ;;  %v988_v18 = vld [vmem:[#allocation4 + $0x8] sm:$0xff] }
 0x1a7   : > { %v855_v3 = vpop.f32.mrf.mxu0 }
 0x1aa   : > { %v869_v4 = vpop.f32.mrf.mxu1 }
 0x1ab   : > { %v870_v10 = vadd.f32 %v869_v4, %v855_v3 }
 0x1ae   : > { %v883_v5 = vpop.f32.mrf.mxu2 }
 0x1af   : > { %v857_v7 = vpop.f32.mrf.mxu0  ;;  %v884_v16 = vadd.f32 %v883_v5, %v870_v10 }
 0x1b1   : > { %v897_v6 = vpop.f32.mrf.mxu3 }
 0x1b2   : > { %v871_v8 = vpop.f32.mrf.mxu1  ;;  %v898_v23 = vadd.f32 %v897_v6, %v884_v16 }
 0x1b3   : > { %v872_v24 = vadd.f32 %v871_v8, %v857_v7 }
 0x1b4   : > { %v967_v30 = vsel %vm965_vm13, %v898_v23, -1e+30  ;;  %v1039_v23 = vld [vmem:[#allocation5 + $0x8] sm:$0xff] }
 0x1b5   : > { %v1040_v38 = vsel %vm1034_vm14, %v967_v30, 0.0 }
 0x1b6   : > { %v885_v12 = vpop.f32.mrf.mxu2 }
 0x1b7   : > { %v886_v28 = vadd.f32 %v885_v12, %v872_v24 }
 0x1b9   : > { %v899_v14 = vpop.f32.mrf.mxu3 }
 0x1ba   : > { %v900_v41 = vadd.f32 %v899_v14, %v886_v28 }
 0x1bc   : > { %v969_v45 = vsel %vm965_vm13, %v900_v41, -1e+30 }
 0x1bd   : > { %v1042_v49 = vsel %vm1036_vm1, %v969_v45, 0.0 }
 0x1e7   : > { %v911_v15 = vpop.f32.mrf.mxu0 }
 0x1e8   : > { %v925_v60 = vpop.f32.mrf.mxu1 }
 0x1e9   : > { %v926_v17 = vadd.f32 %v925_v60, %v911_v15  ;;  %v987_v60 = vld [vmem:[#allocation4] sm:$0xff] }
 0x1ee   : > { %v939_v25 = vpop.f32.mrf.mxu2 }
 0x1ef   : > { %v940_v26 = vadd.f32 %v939_v25, %v926_v17  ;;  %v953_v27 = vpop.f32.mrf.mxu3  ;;  %v913_v34 = vpop.f32.mrf.mxu0 }
 0x1f0   : > { %v927_v35 = vpop.f32.mrf.mxu1 }
 0x1f1   : > { %v954_v29 = vadd.f32 %v953_v27, %v940_v26  ;;  %v928_v42 = vadd.f32 %v927_v35, %v913_v34 }
 0x1f3   : > { %v968_v36 = vsel %vm966_vm15, %v954_v29, -1e+30 }
 0x1f4   : > { %v973_v37 = vmax.f32 %v967_v30, %v968_v36  ;;  %v1041_v40 = vsel %vm1035_vm0, %v968_v36, 0.0 }
 0x1f5   : > { %v1044_v19 = vadd.f32 %v1041_v40, %v1040_v38 }
 0x1f6   : > { %v941_v21 = vpop.f32.mrf.mxu2  ;;  %974 = vmax.xlane.f32.xlu0 %v973_v37 }
 0x1f7   : > { %v942_v43 = vadd.f32 %v941_v21, %v928_v42  ;;  %1045 = vadd.xlane.f32.xlu2 %v1044_v19  ;;  %v955_v44 = vpop.f32.mrf.mxu3 }
 0x1f9   : > { %v956_v46 = vadd.f32 %v955_v44, %v942_v43 }
 0x1fb   : > { %v970_v47 = vsel %vm966_vm15, %v956_v46, -1e+30 }
 0x1fc   : > { %v976_v48 = vmax.f32 %v969_v45, %v970_v47  ;;  %v1043_v50 = vsel %vm1037_vm2, %v970_v47, 0.0 }
 0x1fd   : > { %v1047_v51 = vadd.f32 %v1043_v50, %v1042_v49 }
 0x1fe   : > { %977 = vmax.xlane.f32.xlu0 %v976_v48 }
 0x269   : > { %v975_v33 = vpop.xlane.xlu0 %974 }
 0x26a   : > { %v979_v52 = vmax.f32 %v971_v31, %v975_v33  ;;  %v1046_v53 = vpop.xlane.xlu2 %1045 }
 0x26b   : > { %v1050_v54 = vadd.f32 %v1046_v53, %v1038_v32 }
 0x26c   : > { %v981_v55 = vsub.f32 %v971_v31, %v979_v52  ;;  %1024 = vst.msk [vmem:[#allocation3] sm:$0xff] %vm1021_vm3, %v979_v52  ;;  %993 = vperm.xlu1 %1659, %v979_v52  }
 0x26d   : > { %1052 = vst.msk [vmem:[#allocation5] sm:$0xff] %vm1021_vm3, %v1050_v54 }
 0x26e   : > { %v983_v14 = vmul.f32 1.442695, %v981_v55 }
 0x271   : > { %v978_v58 = vpop.xlane.xlu0 %977 }
 0x272   : > { %v980_v59 = vmax.f32 %v972_v56, %v978_v58 }
 0x274   : > { %v982_v61 = vsub.f32 %v972_v56, %v980_v59  ;;  %1025 = vst.msk [vmem:[#allocation3 + $0x8] sm:$0xff] %vm1021_vm3, %v980_v59  ;;  %998 = vperm.xlu1 %1659, %v980_v59  }
 0x276   : > { %v985_v57 = vmul.f32 1.442695, %v982_v61 }
 0x2de   : > { %v994_v62 = vpop.permute.xlu1 %993 }
 0x2df   : > { %v1001_v63 = vsub.f32 %v967_v30, %v994_v62  ;;  %v1002_v0 = vsub.f32 %v968_v36, %v994_v62 }
 0x2e1   : > { %v1005_v1 = vmul.f32 1.442695, %v1001_v63  ;;  %v1007_v2 = vmul.f32 1.442695, %v1002_v0 }
 0x2e3   : > { %1662 = vpow2.f32 %v1005_v1 }
 0x2e4   : > { %1664 = vpow2.f32 %v1007_v2 }
 0x2e6   : > { %v999_v3 = vpop.permute.xlu1 %998 }
 0x2e7   : > { %v1003_v4 = vsub.f32 %v969_v45, %v999_v3  ;;  %v1004_v5 = vsub.f32 %v970_v47, %v999_v3 }
 0x2e9   : > { %v1663_v6 = vpop.eup %1662  ;;  %v1009_v7 = vmul.f32 1.442695, %v1003_v4  ;;  %v1011_v8 = vmul.f32 1.442695, %v1004_v5 }
 0x2ea   : > { %v1665_v9 = vpop.eup %1664 }
 0x2eb   : > { %1666 = vpow2.f32 %v1009_v7  ;;  %v1013_v10 = vadd.f32 %v1665_v9, %v1663_v6 }
 0x2ec   : > { %1668 = vpow2.f32 %v1011_v8 }
 0x2ed   : > { %1014 = vadd.xlane.f32.xlu0 %v1013_v10  ;;  %1670 = vpow2.f32 %v983_v14 }
 0x2ee   : > { %1672 = vpow2.f32 %v985_v57 }
 0x2f1   : > { %v1667_v11 = vpop.eup %1666 }
 0x2f2   : > { %v1669_v12 = vpop.eup %1668 }
 0x2f3   : > { %v1016_v13 = vadd.f32 %v1669_v12, %v1667_v11  ;;  %v1671_v15 = vpop.eup %1670 }
 0x2f4   : > { %v989_v16 = vmul.f32 %v1671_v15, %v987_v60  ;;  %v1673_v39 = vpop.eup %1672 }
 0x2f5   : > { %1048 = vadd.xlane.f32.xlu0 %v1047_v51  ;;  %1017 = vadd.xlane.f32.xlu1 %v1016_v13  ;;  %v990_v24 = vmul.f32 %v1673_v39, %v988_v18 }
 0x360   : > { %v1015_v22 = vpop.xlane.xlu0 %1014 }
 0x361   : > { %v1019_v17 = vadd.f32 %v1015_v22, %v989_v16 }
 0x363   : > { %1022 = vst.msk [vmem:[#allocation4] sm:$0xff] %vm1021_vm3, %v1019_v17 }
 0x368   : > { %v1018_v25 = vpop.xlane.xlu1 %1017  ;;  %v1049_v26 = vpop.xlane.xlu0 %1048  ;;  %1057 = sbr.rel (%p1485_p1) target bundleno = 1015 (0x3f7), region = 56 }
 0x369   : > { %v1020_v27 = vadd.f32 %v1018_v25, %v990_v24  ;;  %v1051_v28 = vadd.f32 %v1049_v26, %v1039_v23 }
 0x36b   : > { %1023 = vst.msk [vmem:[#allocation4 + $0x8] sm:$0xff] %vm1021_vm3, %v1020_v27 }
 0x36c   : > { %1053 = vst.msk [vmem:[#allocation5 + $0x8] sm:$0xff] %vm1021_vm3, %v1051_v28 }
 0x36d   : > { %v1060_v29 = vld [vmem:[#allocation4] sm:$0xff]  ;;  %v1868_v30 = vmov 0   ;;  %v1058_v36 = vld [vmem:[#allocation3] sm:$0xff]  ;;  %v1059_v19 = vld [vmem:[#allocation3 + $0x8] sm:$0xff] }
 0x36e   : > { %1674 = vset.pattern.permute.xlu0 %v1868_v30  ;;  %1675 = vlog2.f32 %v1060_v29  ;;  %v1068_v40 = vld [vmem:[#allocation5] sm:$0xff] }
 0x372   : > { %v1061_v34 = vld [vmem:[#allocation4 + $0x8] sm:$0xff] }
 0x373   : > { %1677 = vlog2.f32 %v1061_v34  ;;  %v1069_v43 = vld [vmem:[#allocation5 + $0x8] sm:$0xff] }
 0x374   : > { %v1676_v35 = vpop.eup %1675 }
 0x375   : > { %v1063_v38 = vmul.f32 0.6931472, %v1676_v35 }
 0x377   : > { %v1066_v41 = vadd.f32 %v1063_v38, %v1058_v36 }
 0x379   : > { %v1678_v37 = vpop.eup %1677  ;;  %v1070_v20 = vsub.f32 %v1066_v41, %v1068_v40 }
 0x37a   : > { %v1065_v42 = vmul.f32 0.6931472, %v1678_v37 }
 0x37b   : > { %1074 = vperm.xlu0 %1674, %v1070_v20  }
 0x37c   : > { %v1067_v21 = vadd.f32 %v1065_v42, %v1059_v19 }
 0x37e   : > { %v1071_v44 = vsub.f32 %v1067_v21, %v1069_v43 }
 0x383   : > { %1079 = vperm.xlu0 %1674, %v1071_v44  }
 0x3ed   : > { %v1075_v45 = vpop.permute.xlu0 %1074 }
 0x3ee   : > { %1082 = vst [vmem:[#allocation12] sm:$0xff] %v1075_v45 }
 0x3f5   : > { %v1080_v46 = vpop.permute.xlu0 %1079 }
 0x3f6   : > { %1083 = vst [vmem:[#allocation12 + $0x8] sm:$0xff] %v1080_v46 }
 0x3f7 PF: > { %p1590_p3 = scmp.eq.s32.totalorder %s1926_s21, 3  ;;  %s1094_s27 = sshll.u32 %s2241_s4, 4  ;;  %s1095_s27 = int_to_ptr.hbm [resolvable:$true] %s1094_s27 }
 0x3f8   : > { %s1869_s28 = smov [#allocation12]   ;;  %s1870_s30 = smov 128  }
 0x3f9   : > { %s1092_s29 = sshll.u32 %s1869_s28, 4  ;;  %s1871_s5 = smov 8   ;;  %s1093_s29 = int_to_ptr.vmem [resolvable:$true] %s1092_s29 }
 0x3fa   : > { %1571 = dma.vmem_to_hbm [thread:$0]  (%p1590_p3), %s1093_s29, 256, %s1095_s27, [#allocation8], %s1870_s30, %s1870_s30, %s1871_s5  }
 0x3fb   : > { %1834 = dma.done.wait (%p1590_p3), [#allocation8], 256  }
 0x3fc   : > { %1836 = vsyncadd (%p1590_p3), [#allocation8], 4294967040 }
 0x3fd PF: > { %s17_s20 = sadd.s32 1, %s1859_s20   ;;  %s2245_s15 = smov %s1843_s16 }
 0x3fe   : > { %p14_p4 = scmp.ge.s32.totalorder %s17_s20, 6   ;;  %s2246_s16 = smov %s1847_s17 }
 0x3ff   : > { %s2247_s17 = smov %s1976_s25  ;;  %s2248_s18 = smov %s1855_s19 }
 0x400   : > { %s2249_s19 = smov %s2251_s10  ;;  %16 = sbr.rel (!%p14_p4) target bundleno = 5 (0x5), region = 94 }
 0x405   :  { %1111 = vsyncpa [#allocation7], 1 }
 0x406   :  { %1113 = vsyncpa [#allocation7 + $0x1], 1 }
 0x407   :  { %1114 = vsyncpa [#allocation10], 1 }
 0x408   :  { %1115 = vsyncpa [#allocation8], 1 }
 0x409   :  { %1117 = vsyncpa [#allocation8 + $0x1], 1 }

</bundles_post_ra>
